<compile_context>
chip_gen: v5e
topology: v5e:2x2
jax: 0.10.0
libtpu: 0.0.40
codegen_flags: <defaults>
</compile_context>

<pallas_src>
import math

import jax
import jax.numpy as jnp
from jax.experimental import pallas as pl
from jax.experimental.pallas import tpu as pltpu


def _preproc_kernel(emb_ref, pos_ref, mask_ref, out_ref):
    """One grid step = one (batch tile, sequence tile).

    emb_ref : (TB, TN, D)  input embeddings block (input dtype)
    pos_ref : (TN, D)      positional table tile (input dtype) - constant
                           across the inner batch axis, so DMA'd once per TN
    mask_ref: (TB, TN, 1)  precomputed f32 validity mask (sublane-aligned)
    out_ref : (TB, TN, D)  output block (lane-dense, D on lanes, input dtype)
    """
    d = emb_ref.shape[-1]
    scale = jnp.float32(math.sqrt(float(d)))

    ue = emb_ref[...].astype(jnp.float32) * scale
    ue = ue + pos_ref[...].astype(jnp.float32)[None, :, :]
    ue = ue * mask_ref[...]  # (TB, TN, 1) broadcast over D lanes (pure VPU)
    out_ref[...] = ue.astype(out_ref.dtype)


def _choose_tiles(b, n, d, emb_itemsize, budget_bytes=40 * 1024 * 1024):
    """Pick (TB, TN): largest divisor tiles fitting a double-buffered budget.

    Working set per step (double-buffered):
      2x emb-in + 2x out (both at emb dtype) + 2x pos tile + 2x mask.
    TN is aligned to the dtype's sublane pack (8 f32 / 16 bf16 / 32 int8)
    unless it equals the full N (full-dim blocks are always legal).
    """
    row_io = 2 * d * emb_itemsize + 2 * d * emb_itemsize  # emb in + out
    row_mask = 2 * 4                                       # f32 mask, 1 lane
    pos_row = 2 * d * emb_itemsize                         # pos tile rows

    pack = max(8, 32 // max(emb_itemsize, 1))

    def working_set(tb, tn):
        return tb * tn * (row_io + row_mask) + tn * pos_row

    # Sequence tile: prefer full N, otherwise the largest pack-aligned divisor.
    if working_set(1, n) <= budget_bytes:
        tn = n
    else:
        cand = [t for t in range(pack, n, pack)
                if n % t == 0 and working_set(1, t) <= budget_bytes]
        tn = max(cand) if cand else n  # TODO(synk): pad N instead of full-N fallback

    # Batch tile: largest divisor of B still fitting the budget.
    tb = 1
    for t in range(b, 0, -1):
        if b % t == 0 and working_set(t, tn) <= budget_bytes:
            tb = t
            break
    return tb, tn


def learnable_pos_emb_preprocessor(past_lengths, past_ids, past_embeddings, pos_emb_weight):
    """JAX wrapper mirroring the PyTorch module's forward (eval mode).

    Returns (past_lengths, user_embeddings, valid_mask).
    """
    B, N = past_ids.shape
    D = past_embeddings.shape[-1]
    emb_dtype = past_embeddings.dtype
    itemsize = jnp.dtype(emb_dtype).itemsize

    # pos_emb(arange(N)) — streamed at the embedding dtype (up-cast in-kernel).
    pos_slice = pos_emb_weight[:N, :].astype(emb_dtype)
    # Tiny (B, N) compare, done once in XLA; fed sublane-aligned as (B, N, 1).
    valid_mask = (past_ids != 0).astype(jnp.float32)[:, :, None]

    TB, TN = _choose_tiles(B, N, D, itemsize)
    n_seq_tiles = N // TN
    n_batch_tiles = B // TB

    bytes_accessed = (2 * B * N * D * itemsize   # emb in + out
                      + N * D * itemsize         # pos (fetched once per seq tile)
                      + B * N * 4)               # mask
    cost = pl.CostEstimate(flops=3 * B * N * D, transcendentals=0,
                           bytes_accessed=bytes_accessed)

    out_emb = pl.pallas_call(
        _preproc_kernel,
        out_shape=jax.ShapeDtypeStruct((B, N, D), emb_dtype),
        grid_spec=pltpu.PrefetchScalarGridSpec(
            num_scalar_prefetch=0,
            # Batch axis innermost: pos block index is constant across the
            # inner steps, so its DMA is issued only when the seq tile changes.
            grid=(n_seq_tiles, n_batch_tiles),
            in_specs=[
                pl.BlockSpec((TB, TN, D), lambda n, b: (b, n, 0)),  # embeddings
                pl.BlockSpec((TN, D), lambda n, b: (n, 0)),         # pos tile
                pl.BlockSpec((TB, TN, 1), lambda n, b: (b, n, 0)),  # mask
            ],
            out_specs=pl.BlockSpec((TB, TN, D), lambda n, b: (b, n, 0)),
        ),
        compiler_params=pltpu.CompilerParams(
            dimension_semantics=("parallel", "parallel"),
            vmem_limit_bytes=48 * 1024 * 1024,
        ),
        cost_estimate=cost,
    )(past_embeddings, pos_slice, valid_mask)

    return past_lengths, out_emb, valid_mask


def _reference(past_lengths, past_ids, past_embeddings, pos_emb_weight):
    B, N = past_ids.shape
    D = past_embeddings.shape[-1]
    ue = past_embeddings * (D ** 0.5) + pos_emb_weight[:N, :][None, :, :]
    valid_mask = (past_ids != 0).astype(jnp.float32)[:, :, None]
    ue = ue * valid_mask
    return past_lengths, ue.astype(past_embeddings.dtype), valid_mask


if __name__ == "__main__":
    # Small, deterministic example shapes.
    B, N, D = 2, 8, 32
    MAX_SEQ_LEN = 16

    key = jax.random.PRNGKey(0)
    k_pos, k_emb, k_ids, k_len = jax.random.split(key, 4)

    # Deterministic parameter init: truncated normal, std = sqrt(1/D)
    # (mirrors reset_state()).
    pos_emb_weight = (
        jax.random.truncated_normal(k_pos, -2.0, 2.0, (MAX_SEQ_LEN, D), jnp.float32)
        * math.sqrt(1.0 / D)
    )

    past_embeddings = jax.random.normal(k_emb, (B, N, D), jnp.float32)
    # Include some zero ids so the valid-mask path is exercised.
    past_ids = jax.random.randint(k_ids, (B, N), 0, 5).astype(jnp.int32)
    past_lengths = jax.random.randint(k_len, (B,), 1, N + 1).astype(jnp.int32)

    lengths_out, user_emb, valid_mask = jax.block_until_ready(
        learnable_pos_emb_preprocessor(
            past_lengths, past_ids, past_embeddings, pos_emb_weight
        )
    )

    ref_lengths, ref_emb, ref_mask = _reference(
        past_lengths, past_ids, past_embeddings, pos_emb_weight
    )

    assert lengths_out.shape == (B,)
    assert user_emb.shape == (B, N, D)
    assert user_emb.dtype == past_embeddings.dtype
    assert valid_mask.shape == (B, N, 1)
    assert jnp.allclose(lengths_out, ref_lengths)
    assert jnp.allclose(user_emb, ref_emb, atol=1e-5, rtol=1e-5)
    assert jnp.allclose(valid_mask, ref_mask)

    print("KERNEL_OK")
</pallas_src>

<mosaic_0001>
module attributes {stable_mosaic.version = 11 : i64} {
  func.func @_preproc_kernel(%arg0: i32, %arg1: i32, %arg2: memref<2x8x32xf32, #tpu.memory_space<vmem>>, %arg3: memref<8x32xf32, #tpu.memory_space<vmem>>, %arg4: memref<2x8x1xf32, #tpu.memory_space<vmem>>, %arg5: memref<2x8x32xf32, #tpu.memory_space<vmem>>) attributes {dimension_semantics = [#tpu.dimension_semantics<parallel>, #tpu.dimension_semantics<parallel>], iteration_bounds = array<i64: 1, 1>, scalar_prefetch = 0 : i64, scratch_operands = 0 : i64, tpu.core_type = #tpu.core_type<tc>, window_params = [{transform_indices = @transform_0, window_bounds = array<i64: 2, 8, 32>}, {transform_indices = @transform_1, window_bounds = array<i64: 8, 32>}, {transform_indices = @transform_2, window_bounds = array<i64: 2, 8, 1>}, {transform_indices = @transform_3, window_bounds = array<i64: 2, 8, 32>}]} {
    %c0 = arith.constant 0 : index
    %c0_0 = arith.constant 0 : index
    %c0_1 = arith.constant 0 : index
    %0 = vector.load %arg2[%c0, %c0_0, %c0_1] : memref<2x8x32xf32, #tpu.memory_space<vmem>>, vector<2x8x32xf32>
    %cst = arith.constant 5.65685415 : f32
    %1 = vector.broadcast %cst : f32 to vector<2x8x32xf32>
    %2 = arith.mulf %0, %1 : vector<2x8x32xf32>
    %c0_2 = arith.constant 0 : index
    %c0_3 = arith.constant 0 : index
    %3 = vector.load %arg3[%c0_2, %c0_3] : memref<8x32xf32, #tpu.memory_space<vmem>>, vector<8x32xf32>
    %4 = vector.shape_cast %3 : vector<8x32xf32> to vector<1x8x32xf32>
    %5 = vector.broadcast %4 : vector<1x8x32xf32> to vector<2x8x32xf32>
    %6 = arith.addf %2, %5 : vector<2x8x32xf32>
    %c0_4 = arith.constant 0 : index
    %c0_5 = arith.constant 0 : index
    %c0_6 = arith.constant 0 : index
    %7 = vector.load %arg4[%c0_4, %c0_5, %c0_6] : memref<2x8x1xf32, #tpu.memory_space<vmem>>, vector<2x8x1xf32>
    %8 = vector.broadcast %7 : vector<2x8x1xf32> to vector<2x8x32xf32>
    %9 = arith.mulf %6, %8 : vector<2x8x32xf32>
    %c0_7 = arith.constant 0 : index
    %c0_8 = arith.constant 0 : index
    %c0_9 = arith.constant 0 : index
    %10 = vector.load %arg5[%c0_7, %c0_8, %c0_9] : memref<2x8x32xf32, #tpu.memory_space<vmem>>, vector<2x8x32xf32>
    tpu.vector_store %arg5[%c0_7, %c0_8, %c0_9], %9 {strides = array<i32>} : memref<2x8x32xf32, #tpu.memory_space<vmem>>, vector<2x8x32xf32>,
    return
  }
  func.func @transform_0(%arg0: i32, %arg1: i32) -> (i32, i32, i32) {
    %c0_i32 = arith.constant 0 : i32
    %c0_i32_0 = arith.constant 0 : i32
    return %arg1, %arg0, %c0_i32 : i32, i32, i32
  }
  func.func @transform_1(%arg0: i32, %arg1: i32) -> (i32, i32) {
    %c0_i32 = arith.constant 0 : i32
    %c0_i32_0 = arith.constant 0 : i32
    return %arg0, %c0_i32 : i32, i32
  }
  func.func @transform_2(%arg0: i32, %arg1: i32) -> (i32, i32, i32) {
    %c0_i32 = arith.constant 0 : i32
    %c0_i32_0 = arith.constant 0 : i32
    return %arg1, %arg0, %c0_i32 : i32, i32, i32
  }
  func.func @transform_3(%arg0: i32, %arg1: i32) -> (i32, i32, i32) {
    %c0_i32 = arith.constant 0 : i32
    %c0_i32_0 = arith.constant 0 : i32
    return %arg1, %arg0, %c0_i32 : i32, i32, i32
  }
}

</mosaic_0001>

<bundles_post_ra>
// kernel: tpu_custom_call.1
= control target key start
LH: loop header
LB: loop body
LE: loop exit
PB: predicated region body
PF: predicated region fallthrough
CT: control target
= control target key end

     0   :  { %8 = vsyncpa [#allocation3], 0  ;;  %s173_s0 = inlined_call_operand.vmem [shape: f32[2,8,32], index: 0, kind: input, shape index: {}]   ;;  %s174_s1 = inlined_call_operand.hbm [shape: f32[8,32], index: 1, kind: input, shape index: {}]   ;;  %s175_s2 = inlined_call_operand.vmem [shape: f32[2,8,1], index: 2, kind: input, shape index: {}]   ;;  %s176_s3 = inlined_call_operand.hbm [shape: f32[2,8,32], index: 3, kind: output, shape index: {}]  }
   0x1   :  { %9 = vsyncpa [#allocation4], 0  ;;  %s17_s14 = sshll.u32 %s174_s1, 4  ;;  %s130_s15 = smov [#allocation2]   ;;  %s18_s14 = int_to_ptr.hbm [resolvable:$true] %s17_s14 }
   0x2   :  { %s19_s16 = sshll.u32 %s130_s15, 4  ;;  %s20_s16 = int_to_ptr.vmem [resolvable:$true] %s19_s16 }
   0x3   :  { %22 = dma.hbm_to_vmem [thread:$0]  %s18_s14, 128, %s20_s16, [#allocation3]  }
   0x4   :  { %126 = dma.done.wait [#allocation3], 128  }
   0x5   :  { %127 = vsyncadd [#allocation3], 4294967168  ;;  %v131_v0 = vmov 0   ;;  %v36_v1 = vld [vmem:[%s175_s2] sm:$0xff]  ;;  %v37_v2 = vld [vmem:[%s175_s2 + $0x8] sm:$0xff]  ;;  %vm50_vm0 = vcmask 261120  }
   0x6   :  { %77 = vset.pattern.permute.xlu0 %v131_v0  ;;  %v29_v3 = vld [vmem:[%s173_s0] sm:$0xff]  ;;  %v30_v7 = vld [vmem:[%s173_s0 + $0x8] sm:$0xff]  ;;  %s132_s24 = smov [#allocation5]   ;;  %s59_s27 = sshll.u32 %s176_s3, 4  ;;  %s60_s27 = int_to_ptr.hbm [resolvable:$true] %s59_s27 }
   0x7   :  { %40 = vperm.xlu0 %77, %v36_v1   ;;  %v31_v4 = vmul.f32 5.656854, %v29_v3  ;;  %v33_v5 = vld [vmem:[#allocation2] sm:$0xff]  ;;  %v32_v10 = vmul.f32 5.656854, %v30_v7  ;;  %s57_s2 = sshll.u32 %s132_s24, 4  ;;  %s58_s2 = int_to_ptr.vmem [resolvable:$true] %s57_s2 }
   0x8   :  { %s133_s28 = smov 128   ;;  %s134_s29 = smov 8  }
   0x9   :  { %v34_v6 = vadd.f32 %v33_v5, %v31_v4  ;;  %v35_v11 = vadd.f32 %v33_v5, %v32_v10 }
   0xf   :  { %45 = vperm.xlu0 %77, %v37_v2  }
  0x79   :  { %v41_v8 = vpop.permute.xlu0 %40 }
  0x7a   :  { %v48_v9 = vmul.f32 %v41_v8, %v34_v6 }
  0x7c   :  { %51 = vst.msk [vmem:[#allocation5] sm:$0xff] %vm50_vm0, %v48_v9 }
  0x81   :  { %v46_v12 = vpop.permute.xlu0 %45 }
  0x82   :  { %v49_v13 = vmul.f32 %v46_v12, %v35_v11 }
  0x84   :  { %52 = vst.msk [vmem:[#allocation5 + $0x8] sm:$0xff] %vm50_vm0, %v49_v13 }
  0x85   :  { %65 = dma.vmem_to_hbm [thread:$0]  %s58_s2, 256, %s60_s27, [#allocation4], %s133_s28, %s133_s28, %s134_s29  }
  0x86   :  { %128 = dma.done.wait [#allocation4], 256  }
  0x87   :  { %129 = vsyncadd [#allocation4], 4294967040 }
  0x88   :  { %70 = vsyncpa [#allocation3], 1 }
  0x89   :  { %71 = vsyncpa [#allocation4], 1 }

</bundles_post_ra>
